<compile_context>
chip_gen: v7x
topology: tpu7x:2x2x1
jax: 0.10.0
libtpu: 0.0.40
codegen_flags: <defaults>
</compile_context>

<pallas_src>
import functools

import jax
import jax.numpy as jnp
from jax.experimental import pallas as pl
from jax.experimental.pallas import tpu as pltpu


def _round_up(n, m):
    return ((n + m - 1) // m) * m


def _layer_norm_kernel(x_ref, gamma_ref, beta_ref, o_ref, *, eps, hidden):
    x = x_ref[...].astype(jnp.float32)        # (tile_rows, hidden)
    gamma = gamma_ref[...]                    # (1, hidden), f32
    beta = beta_ref[...]                      # (1, hidden), f32

    inv_h = jnp.float32(1.0 / hidden)
    # Two independent row reductions (overlap on the XLU).
    s1 = jnp.sum(x, axis=-1, keepdims=True)
    s2 = jnp.sum(x * x, axis=-1, keepdims=True)
    mean = s1 * inv_h
    var = jnp.maximum(s2 * inv_h - mean * mean, jnp.float32(0.0))
    std = jnp.sqrt(var)
    # Per-row reciprocal on a (tile_rows, 1) vector instead of a full-tile divide.
    # approx=False keeps accuracy close to the PyTorch reference.
    inv = pl.reciprocal(std + jnp.float32(eps), approx=False)

    out = (x - mean) * (gamma * inv) + beta
    o_ref[...] = out.astype(o_ref.dtype)


def layer_norm(x, gamma, beta, eps=1e-6, vmem_tile_budget_bytes=24 << 20):
    """x: (..., hidden). gamma/beta: (hidden,). Returns same shape/dtype as x."""
    orig_shape = x.shape
    hidden = orig_shape[-1]
    rows = 1
    for d in orig_shape[:-1]:
        rows *= d

    x2 = x.reshape(rows, hidden)              # free (row-major metadata reshape)
    itemsize = jnp.dtype(x.dtype).itemsize

    # Lane-padded hidden only for the VMEM footprint estimate (the actual block
    # uses the full, unpadded hidden so no HBM padding copies are needed).
    hidden_lanes = max(_round_up(hidden, 128), 128)
    row_mult = 8 if itemsize >= 4 else 16

    # Tile rows sized against the VMEM budget: in + out, each double-buffered.
    bytes_per_row = 2 * 2 * hidden_lanes * itemsize
    tile_rows = max(vmem_tile_budget_bytes // bytes_per_row, row_mult)
    tile_rows = min(tile_rows, 1024)
    if rows >= row_mult:
        tile_rows = min(tile_rows, _round_up(rows, row_mult))
        tile_rows = _round_up(tile_rows, row_mult)
    else:
        # Fewer rows than one sublane group: block spans the full row dim.
        tile_rows = rows

    grid = (pl.cdiv(rows, tile_rows),)        # ragged last tile handled by Pallas

    gamma2 = gamma.astype(jnp.float32).reshape(1, hidden)
    beta2 = beta.astype(jnp.float32).reshape(1, hidden)

    kernel = functools.partial(_layer_norm_kernel, eps=float(eps), hidden=hidden)

    out = pl.pallas_call(
        kernel,
        out_shape=jax.ShapeDtypeStruct((rows, hidden), x.dtype),
        grid_spec=pltpu.PrefetchScalarGridSpec(
            num_scalar_prefetch=0,
            grid=grid,
            in_specs=[
                pl.BlockSpec((tile_rows, hidden), lambda i: (i, 0)),
                pl.BlockSpec((1, hidden), lambda i: (0, 0)),
                pl.BlockSpec((1, hidden), lambda i: (0, 0)),
            ],
            out_specs=pl.BlockSpec((tile_rows, hidden), lambda i: (i, 0)),
        ),
        compiler_params=pltpu.CompilerParams(
            dimension_semantics=("parallel",),
            vmem_limit_bytes=48 << 20,
        ),
    )(x2, gamma2, beta2)

    return out.reshape(orig_shape)


def _reference(x, gamma, beta, eps):
    xf = x.astype(jnp.float32)
    mean = jnp.mean(xf, axis=-1, keepdims=True)
    std = jnp.sqrt(jnp.mean((xf - mean) ** 2, axis=-1, keepdims=True))
    return gamma.astype(jnp.float32) * (xf - mean) / (std + eps) + beta.astype(jnp.float32)


if __name__ == "__main__":
    key = jax.random.PRNGKey(0)

    # Case 1: shapes implied by the module (batch=2, seq=8, hidden=32).
    batch, seq, hidden = 2, 8, 32
    x = jax.random.normal(key, (batch, seq, hidden), dtype=jnp.float32)
    gamma = jnp.ones((hidden,), dtype=jnp.float32)   # nn.Parameter(torch.ones)
    beta = jnp.zeros((hidden,), dtype=jnp.float32)   # nn.Parameter(torch.zeros)

    out = jax.block_until_ready(layer_norm(x, gamma, beta, eps=1e-6))
    ref = _reference(x, gamma, beta, 1e-6)
    assert jnp.allclose(out, ref, atol=1e-4, rtol=1e-4), "mismatch vs reference (case 1)"

    # Case 2: odd rows / non-128-multiple hidden (ragged row tile, no padding).
    x2 = jax.random.normal(jax.random.PRNGKey(1), (3, 5, 200), dtype=jnp.float32)
    g2 = jax.random.normal(jax.random.PRNGKey(2), (200,), dtype=jnp.float32)
    b2 = jax.random.normal(jax.random.PRNGKey(3), (200,), dtype=jnp.float32)
    out2 = jax.block_until_ready(layer_norm(x2, g2, b2, eps=1e-6))
    ref2 = _reference(x2, g2, b2, 1e-6)
    assert jnp.allclose(out2, ref2, atol=1e-4, rtol=1e-4), "mismatch vs reference (case 2)"

    # Case 3: bf16 input to exercise the 16-sublane tile path (compute is f32).
    x3 = jax.random.normal(jax.random.PRNGKey(4), (4, 16, 256), dtype=jnp.bfloat16)
    g3 = jnp.ones((256,), dtype=jnp.bfloat16)
    b3 = jnp.zeros((256,), dtype=jnp.bfloat16)
    out3 = jax.block_until_ready(layer_norm(x3, g3, b3, eps=1e-6))
    ref3 = _reference(x3, g3, b3, 1e-6)
    assert jnp.allclose(out3.astype(jnp.float32), ref3, atol=3e-2, rtol=3e-2), \
        "mismatch vs reference (case 3)"

    print("KERNEL_OK")
</pallas_src>

<mosaic_0001>
module attributes {stable_mosaic.version = 11 : i64} {
  func.func @_layer_norm_kernel(%arg0: i32, %arg1: memref<16x32xf32, #tpu.memory_space<vmem>>, %arg2: memref<1x32xf32, #tpu.memory_space<vmem>>, %arg3: memref<1x32xf32, #tpu.memory_space<vmem>>, %arg4: memref<16x32xf32, #tpu.memory_space<vmem>>) attributes {dimension_semantics = [#tpu.dimension_semantics<parallel>], iteration_bounds = array<i64: 1>, scalar_prefetch = 0 : i64, scratch_operands = 0 : i64, tpu.core_type = #tpu.core_type<tc>, window_params = [{transform_indices = @transform_0, window_bounds = array<i64: 16, 32>}, {pipeline_mode = #tpu.pipeline_mode<synchronous>, transform_indices = @transform_1, window_bounds = array<i64: 1, 32>}, {pipeline_mode = #tpu.pipeline_mode<synchronous>, transform_indices = @transform_2, window_bounds = array<i64: 1, 32>}, {transform_indices = @transform_3, window_bounds = array<i64: 16, 32>}]} {
    %c0 = arith.constant 0 : index
    %c0_0 = arith.constant 0 : index
    %0 = vector.load %arg1[%c0, %c0_0] : memref<16x32xf32, #tpu.memory_space<vmem>>, vector<16x32xf32>
    %c0_1 = arith.constant 0 : index
    %c0_2 = arith.constant 0 : index
    %1 = vector.load %arg2[%c0_1, %c0_2] : memref<1x32xf32, #tpu.memory_space<vmem>>, vector<1x32xf32>
    %c0_3 = arith.constant 0 : index
    %c0_4 = arith.constant 0 : index
    %2 = vector.load %arg3[%c0_3, %c0_4] : memref<1x32xf32, #tpu.memory_space<vmem>>, vector<1x32xf32>
    %cst = arith.constant dense<0.000000e+00> : vector<16xf32>
    %3 = vector.multi_reduction <add>, %0, %cst [1] : vector<16x32xf32> to vector<16xf32>
    %4 = vector.shape_cast %3 : vector<16xf32> to vector<16x1xf32>
    %5 = arith.mulf %0, %0 : vector<16x32xf32>
    %cst_5 = arith.constant dense<0.000000e+00> : vector<16xf32>
    %6 = vector.multi_reduction <add>, %5, %cst_5 [1] : vector<16x32xf32> to vector<16xf32>
    %7 = vector.shape_cast %6 : vector<16xf32> to vector<16x1xf32>
    %cst_6 = arith.constant 3.125000e-02 : f32
    %8 = vector.broadcast %cst_6 : f32 to vector<16x1xf32>
    %9 = arith.mulf %4, %8 : vector<16x1xf32>
    %cst_7 = arith.constant 3.125000e-02 : f32
    %10 = vector.broadcast %cst_7 : f32 to vector<16x1xf32>
    %11 = arith.mulf %7, %10 : vector<16x1xf32>
    %12 = arith.mulf %9, %9 : vector<16x1xf32>
    %13 = arith.subf %11, %12 : vector<16x1xf32>
    %cst_8 = arith.constant 0.000000e+00 : f32
    %14 = vector.broadcast %cst_8 : f32 to vector<16x1xf32>
    %15 = arith.maximumf %13, %14 : vector<16x1xf32>
    %16 = math.sqrt %15 : vector<16x1xf32>
    %cst_9 = arith.constant 9.99999997E-7 : f32
    %17 = vector.broadcast %cst_9 : f32 to vector<16x1xf32>
    %18 = arith.addf %16, %17 : vector<16x1xf32>
    %19 = tpu.reciprocal %18 : vector<16x1xf32> -> vector<16x1xf32>
    %20 = vector.broadcast %9 : vector<16x1xf32> to vector<16x32xf32>
    %21 = arith.subf %0, %20 : vector<16x32xf32>
    %22 = vector.broadcast %1 : vector<1x32xf32> to vector<16x32xf32>
    %23 = vector.broadcast %19 : vector<16x1xf32> to vector<16x32xf32>
    %24 = arith.mulf %22, %23 : vector<16x32xf32>
    %25 = arith.mulf %21, %24 : vector<16x32xf32>
    %26 = vector.broadcast %2 : vector<1x32xf32> to vector<16x32xf32>
    %27 = arith.addf %25, %26 : vector<16x32xf32>
    %c0_10 = arith.constant 0 : index
    %c0_11 = arith.constant 0 : index
    %28 = vector.load %arg4[%c0_10, %c0_11] : memref<16x32xf32, #tpu.memory_space<vmem>>, vector<16x32xf32>
    tpu.vector_store %arg4[%c0_10, %c0_11], %27 {strides = array<i32>} : memref<16x32xf32, #tpu.memory_space<vmem>>, vector<16x32xf32>,
    return
  }
  func.func @transform_0(%arg0: i32) -> (i32, i32) {
    %c0_i32 = arith.constant 0 : i32
    %c0_i32_0 = arith.constant 0 : i32
    return %arg0, %c0_i32 : i32, i32
  }
  func.func @transform_1(%arg0: i32) -> (i32, i32) {
    %c0_i32 = arith.constant 0 : i32
    %c0_i32_0 = arith.constant 0 : i32
    %c0_i32_1 = arith.constant 0 : i32
    return %c0_i32, %c0_i32_0 : i32, i32
  }
  func.func @transform_2(%arg0: i32) -> (i32, i32) {
    %c0_i32 = arith.constant 0 : i32
    %c0_i32_0 = arith.constant 0 : i32
    %c0_i32_1 = arith.constant 0 : i32
    return %c0_i32, %c0_i32_0 : i32, i32
  }
  func.func @transform_3(%arg0: i32) -> (i32, i32) {
    %c0_i32 = arith.constant 0 : i32
    %c0_i32_0 = arith.constant 0 : i32
    return %arg0, %c0_i32 : i32, i32
  }
}

</mosaic_0001>

<bundles_post_ra>
// kernel: tpu_custom_call.1
= control target key start
LH: loop header
LB: loop body
LE: loop exit
PB: predicated region body
PF: predicated region fallthrough
CT: control target
= control target key end

     0   :  { %8 = vsyncpa [#allocation3], 0  ;;  %s243_s0 = inlined_call_operand.hbm [shape: f32[16,32], index: 0, kind: input, shape index: {}]   ;;  %s244_s1 = inlined_call_operand.vmem [shape: f32[1,32], index: 1, kind: input, shape index: {}]   ;;  %s245_s2 = inlined_call_operand.vmem [shape: f32[1,32], index: 2, kind: input, shape index: {}]   ;;  %s246_s3 = inlined_call_operand.hbm [shape: f32[16,32], index: 3, kind: output, shape index: {}]  }
   0x1   :  { %9 = vsyncpa [#allocation4], 0  ;;  %s177_s12 = smov [#allocation2]   ;;  %s129_s16 = scalar_lea.hbm %s243_s0, 256 }
   0x2   :  { %s15_s13 = sshll.u32 %s177_s12, 4  ;;  %p130_p0 = scmp.ne.s32.totalorder %s243_s0, %s129_s16  ;;  %s16_s13 = int_to_ptr.vmem [resolvable:$true] %s15_s13 }
   0x3   :  { %p133_p1 = scmp.lt.u32.totalorder %s129_s16, %s243_s0 }
   0x5   :  { %p135_p2 = pnand %p133_p1, %p130_p0 }
   0x7   :  { %138 = shalt.err (!%p135_p2)
}
   0x8   :  { %s139_s21 = scalar_lea.vmem %s16_s13, 256  ;;  %p144_p4 = scmp.lt.s32.totalorder %s16_s13, %s16_s13 }
   0x9   :  { %p140_p3 = scmp.ne.s32.totalorder %s16_s13, %s139_s21  ;;  %p145_p5 = scmp.lt.s32.totalorder %s139_s21, %s139_s21 }
   0xb   :  { %p146_p6 = por %p145_p5, %p144_p4 }
   0xd   :  { %p147_p7 = pnand %p146_p6, %p140_p3 }
   0xf   :  { %150 = shalt.err (!%p147_p7)
}
  0x10   :  { %s178_s22 = smov 128   ;;  %s179_s23 = smov 8  }
  0x11   :  { %21 = dma.hbm_to_vmem [thread:$0]  %s243_s0, 256, %s16_s13, [#allocation3], %s178_s22, %s178_s22, %s179_s23  }
  0x12   :  { %173 = dma.done.wait [#allocation3], 256  }
  0x13   :  { %174 = vsyncadd [#allocation3], 4294967040  ;;  %vm33_vm0 = vcmask 261120   ;;  %v29_v0 = vld [vmem:[#allocation2] sm:$0xff]  ;;  %v30_v1 = vld [vmem:[#allocation2 + $0x8] sm:$0xff]  ;;  %s180_s29 = smov [#allocation5]  }
  0x14   :  { %v34_v2 = vsel %vm33_vm0, %v29_v0, 0.0  ;;  %v40_v3 = vmul.f32 %v29_v0, %v29_v0  ;;  %v41_v4 = vmul.f32 %v30_v1, %v30_v1  ;;  %v37_v6 = vsel %vm33_vm0, %v30_v1, 0.0  ;;  %v115_v34 = vld [vmem:[%s244_s1] ss:$0 sm:$0xff]  ;;  %s103_s30 = sshll.u32 %s180_s29, 4  ;;  %s104_s30 = int_to_ptr.vmem [resolvable:$true] %s103_s30 }
  0x15   :  { %35 = vadd.xlane.f32.xlu0 %v34_v2  ;;  %v116_v38 = vld [vmem:[%s245_s2] ss:$0 sm:$0xff]  ;;  %s151_s1 = scalar_lea.vmem %s104_s30, 256  ;;  %p156_p9 = scmp.lt.s32.totalorder %s104_s30, %s104_s30 }
  0x16   :  { %v42_v5 = vsel %vm33_vm0, %v40_v3, 0.0  ;;  %v45_v7 = vsel %vm33_vm0, %v41_v4, 0.0  ;;  %p152_p8 = scmp.ne.s32.totalorder %s104_s30, %s151_s1  ;;  %p157_p10 = scmp.lt.s32.totalorder %s151_s1, %s151_s1 }
  0x17   :  { %43 = vadd.xlane.f32.xlu1 %v42_v5 }
  0x18   :  { %p158_p11 = por %p157_p10, %p156_p9 }
  0x19   :  { %38 = vadd.xlane.f32.xlu0 %v37_v6 }
  0x1a   :  { %p159_p12 = pnand %p158_p11, %p152_p8 }
  0x1b   :  { %46 = vadd.xlane.f32.xlu1 %v45_v7 }
  0xa2   :  { %v36_v8 = vpop.xlane.xlu0 %35 }
  0xa3   :  { %v48_v9 = vmul.f32 0.03125, %v36_v8 }
  0xa4   :  { %v44_v10 = vpop.xlane.xlu1 %43 }
  0xa5   :  { %v52_v11 = vmul.f32 %v48_v9, %v48_v9  ;;  %v50_v12 = vmul.f32 0.03125, %v44_v10  ;;  %v76_v36 = vsub.f32 %v29_v0, %v48_v9 }
  0xa6   :  { %v39_v13 = vpop.xlane.xlu0 %38 }
  0xa7   :  { %v54_v14 = vsub.f32 %v50_v12, %v52_v11  ;;  %v49_v15 = vmul.f32 0.03125, %v39_v13 }
  0xa8   :  { %v47_v16 = vpop.xlane.xlu1 %46 }
  0xa9   :  { %v56_v17 = vmax.f32 %v54_v14, 0.0  ;;  %v53_v18 = vmul.f32 %v49_v15, %v49_v15  ;;  %v51_v19 = vmul.f32 0.03125, %v47_v16  ;;  %v77_v42 = vsub.f32 %v30_v1, %v49_v15 }
  0xab   :  { %121 = vrsqrt.f32 %v56_v17  ;;  %v55_v20 = vsub.f32 %v51_v19, %v53_v18  ;;  %vm60_vm1 = vcmp.eq.f32.partialorder %v56_v17, inf  ;;  %v63_v24 = vand.u32 2147483648, %v56_v17 }
  0xac   :  { %vm62_vm2 = vcmp.eq.f32.partialorder %v56_v17, 0.0 }
  0xad   :  { %v57_v21 = vmax.f32 %v55_v20, 0.0 }
  0xaf   :  { %123 = vrsqrt.f32 %v57_v21  ;;  %vm67_vm3 = vcmp.eq.f32.partialorder %v57_v21, inf  ;;  %v70_v30 = vand.u32 2147483648, %v57_v21  ;;  %vm69_vm4 = vcmp.eq.f32.partialorder %v57_v21, 0.0 }
  0xb5   :  { %v122_v22 = vpop.eup %121 }
  0xb6   :  { %v59_v23 = vmul.f32 %v122_v22, %v56_v17 }
  0xb8   :  { %v61_v25 = vsel %vm60_vm1, %v56_v17, %v59_v23 }
  0xb9   :  { %v64_v26 = vsel %vm62_vm2, %v63_v24, %v61_v25  ;;  %v124_v27 = vpop.eup %123 }
  0xba   :  { %v72_v28 = vadd.f32 1e-06, %v64_v26  ;;  %v66_v29 = vmul.f32 %v124_v27, %v57_v21 }
  0xbc   :  { %125 = vrcp.f32 %v72_v28  ;;  %v68_v31 = vsel %vm67_vm3, %v57_v21, %v66_v29 }
  0xbd   :  { %v71_v32 = vsel %vm69_vm4, %v70_v30, %v68_v31 }
  0xbe   :  { %v73_v33 = vadd.f32 1e-06, %v71_v32 }
  0xc0   :  { %127 = vrcp.f32 %v73_v33 }
  0xc6   :  { %v126_v35 = vpop.eup %125 }
  0xc7   :  { %v84_v37 = vmul.f32 %v126_v35, %v115_v34 }
  0xc9   :  { %v86_v39 = vmul.f32 %v84_v37, %v76_v36 }
  0xca   :  { %v128_v40 = vpop.eup %127 }
  0xcb   :  { %v94_v41 = vadd.f32 %v116_v38, %v86_v39  ;;  %v85_v43 = vmul.f32 %v128_v40, %v115_v34 }
  0xcd   :  { %96 = vst.msk [vmem:[#allocation5] sm:$0xff] %vm33_vm0, %v94_v41  ;;  %v87_v44 = vmul.f32 %v85_v43, %v77_v42 }
  0xcf   :  { %v95_v45 = vadd.f32 %v116_v38, %v87_v44 }
  0xd1   :  { %97 = vst.msk [vmem:[#allocation5 + $0x8] sm:$0xff] %vm33_vm0, %v95_v45 }
  0xd2   :  { %162 = shalt.err (!%p159_p12)
}
  0xd3   :  { %s163_s5 = scalar_lea.hbm %s246_s3, 256 }
  0xd4   :  { %p164_p13 = scmp.ne.s32.totalorder %s246_s3, %s163_s5  ;;  %p167_p0 = scmp.lt.u32.totalorder %s163_s5, %s246_s3 }
  0xd6   :  { %p169_p1 = pnand %p167_p0, %p164_p13 }
  0xd8   :  { %172 = shalt.err (!%p169_p1)
}
  0xd9   :  { %109 = dma.vmem_to_hbm [thread:$0]  %s104_s30, 256, %s246_s3, [#allocation4], %s178_s22, %s178_s22, %s179_s23  }
  0xda   :  { %175 = dma.done.wait [#allocation4], 256  }
  0xdb   :  { %176 = vsyncadd [#allocation4], 4294967040 }
  0xdc   :  { %113 = vsyncpa [#allocation3], 1 }
  0xdd   :  { %114 = vsyncpa [#allocation4], 1 }

</bundles_post_ra>
